<compile_context>
chip_gen: v7x
topology: tpu7x:2x2x1
jax: 0.10.0
libtpu: 0.0.40
codegen_flags: <defaults>
</compile_context>

<pallas_src>
import functools

import jax
import jax.numpy as jnp
from jax.experimental import pallas as pl
from jax.experimental.pallas import tpu as pltpu

K_HOPS = 3            # SGC default number of propagation hops
BN_EPS = 1e-5         # torch.nn.BatchNorm1d default eps
_LANE = 128
_TM_CAP = 512         # row-tile cap (512-wide tiles ~85% of HBM roofline)
_TK_CAP = 512         # reduction-tile cap for the streamed (LHS) operand


# ------------------------------- sizing helpers -------------------------------

def _round_up(x, m):
    return ((x + m - 1) // m) * m


def _pad_dim(n, cap=_TM_CAP):
    """Pad so a cap-sized (or full-extent) tile divides exactly (no tile shrink)."""
    if n <= cap:
        return _round_up(n, _LANE)
    return _round_up(n, cap)


def _pick_tile(dim, cap):
    """Largest multiple of 128 <= cap that divides `dim` (dim is a multiple of 128)."""
    t = max(_LANE, (min(cap, dim) // _LANE) * _LANE)
    while t > _LANE and dim % t:
        t -= _LANE
    return t


def _row_tile(m, cap=_TM_CAP):
    tm = _pick_tile(m, cap)
    # Keep the 'parallel' row axis at extent >= 2 where possible so it can
    # shard across v7x's two TensorCores (no-op on single-TC v5e/v6e).
    if m // tm < 2 and tm % (2 * _LANE) == 0:
        tm //= 2
    return tm


def _vmem_budget():
    """~75% of physical VMEM (v5e/v6e: 128 MiB -> 96 MiB, v7x: 64 MiB -> 48 MiB)."""
    cap = 64 * 1024 * 1024
    try:
        info = pltpu.get_tpu_info()
        cap = int(getattr(info, "vmem_capacity_bytes", cap))
    except Exception:
        pass
    return (cap * 3) // 4


def _rhs_resident_fits(kd, nr, tm, tk, in_itemsize, budget, extra_bytes=0):
    """Conservative VMEM estimate for the resident-RHS matmul kernel."""
    resident = 2 * kd * nr * in_itemsize        # full RHS (double-buffer worst case)
    lhs_stream = 2 * tm * tk * in_itemsize      # streamed LHS tiles (double-buffered)
    out_stream = 2 * tm * nr * 4                # output blocks (f32 upper bound)
    acc = tm * nr * 4                           # f32 accumulator scratch
    return resident + lhs_stream + out_stream + acc + extra_bytes <= (budget * 9) // 10


# ------------------------------- kernels --------------------------------------

def _mm_resident_kernel(a_ref, b_ref, o_ref, acc_ref, *, tk):
    """o = a @ b with the full RHS VMEM-resident; reduction is grid axis 1."""
    k = pl.program_id(1)

    @pl.when(k == 0)
    def _():
        acc_ref[...] = jnp.zeros_like(acc_ref)

    start = pl.multiple_of(k * tk, tk)
    acc_ref[...] += jnp.dot(a_ref[...], b_ref[pl.ds(start, tk), :],
                            preferred_element_type=jnp.float32)

    @pl.when(k == pl.num_programs(1) - 1)
    def _():
        o_ref[...] = acc_ref[...].astype(o_ref.dtype)


def _mm_resident_tail_kernel(a_ref, b_ref, b1_ref, w2_ref, b2_ref, o_ref,
                             acc_ref, *, tk):
    """Final hop fused with the MLP tail: o = relu(a @ b + b1) @ w2 + b2."""
    k = pl.program_id(1)

    @pl.when(k == 0)
    def _():
        acc_ref[...] = jnp.zeros_like(acc_ref)

    start = pl.multiple_of(k * tk, tk)
    acc_ref[...] += jnp.dot(a_ref[...], b_ref[pl.ds(start, tk), :],
                            preferred_element_type=jnp.float32)

    @pl.when(k == pl.num_programs(1) - 1)
    def _():
        # TODO(synk): F.dropout in training mode is stochastic; inference
        # (identity) semantics are used here.
        h = jnp.maximum(acc_ref[...] + b1_ref[...], 0.0)
        o_ref[...] = (jnp.dot(h.astype(w2_ref.dtype), w2_ref[...],
                              preferred_element_type=jnp.float32)
                      + b2_ref[...]).astype(o_ref.dtype)


def _mm_tiled_kernel(a_ref, b_ref, o_ref, acc_ref):
    """Fallback tiled matmul (3-D grid), f32 accumulation."""
    @pl.when(pl.program_id(2) == 0)
    def _():
        acc_ref[...] = jnp.zeros_like(acc_ref)

    acc_ref[...] += jnp.dot(a_ref[...], b_ref[...],
                            preferred_element_type=jnp.float32)

    @pl.when(pl.program_id(2) == pl.num_programs(2) - 1)
    def _():
        o_ref[...] = acc_ref[...].astype(o_ref.dtype)


def _mlp_tail_kernel(ft_ref, b1_ref, w2_ref, b2_ref, o_ref):
    """Fallback separate tail: (folded-BN) bias + ReLU + fc2 over node rows."""
    h = jnp.maximum(ft_ref[...].astype(jnp.float32) + b1_ref[...], 0.0)
    o_ref[...] = (jnp.dot(h.astype(w2_ref.dtype), w2_ref[...],
                          preferred_element_type=jnp.float32)
                  + b2_ref[...]).astype(o_ref.dtype)


# ------------------------------- pallas_call wrappers --------------------------

def _mm_resident_call(a, b, out_dtype, tm, tk, vmem_limit):
    m, kd = a.shape
    _, nr = b.shape
    cost = pl.CostEstimate(
        flops=2 * m * kd * nr, transcendentals=0,
        bytes_accessed=(m * kd * a.dtype.itemsize + kd * nr * b.dtype.itemsize
                        + m * nr * jnp.dtype(out_dtype).itemsize))
    return pl.pallas_call(
        functools.partial(_mm_resident_kernel, tk=tk),
        out_shape=jax.ShapeDtypeStruct((m, nr), out_dtype),
        grid_spec=pltpu.PrefetchScalarGridSpec(
            num_scalar_prefetch=0,
            grid=(m // tm, kd // tk),
            in_specs=[pl.BlockSpec((tm, tk), lambda i, k: (i, k)),
                      pl.BlockSpec((kd, nr), lambda i, k: (0, 0))],  # resident RHS
            out_specs=pl.BlockSpec((tm, nr), lambda i, k: (i, 0)),
            scratch_shapes=[pltpu.VMEM((tm, nr), jnp.float32)]),
        compiler_params=pltpu.CompilerParams(
            dimension_semantics=("parallel", "arbitrary"),
            vmem_limit_bytes=vmem_limit),
        cost_estimate=cost,
    )(a, b)


def _mm_resident_tail_call(a, b, b1, w2, b2, tm, tk, vmem_limit):
    m, kd = a.shape
    _, nr = b.shape
    cp = w2.shape[1]
    cost = pl.CostEstimate(
        flops=2 * m * kd * nr + 2 * m * nr * cp + 2 * m * nr,
        transcendentals=0,
        bytes_accessed=(m * kd * a.dtype.itemsize + kd * nr * b.dtype.itemsize
                        + nr * cp * w2.dtype.itemsize + m * cp * 4))
    return pl.pallas_call(
        functools.partial(_mm_resident_tail_kernel, tk=tk),
        out_shape=jax.ShapeDtypeStruct((m, cp), jnp.float32),
        grid_spec=pltpu.PrefetchScalarGridSpec(
            num_scalar_prefetch=0,
            grid=(m // tm, kd // tk),
            in_specs=[pl.BlockSpec((tm, tk), lambda i, k: (i, k)),
                      pl.BlockSpec((kd, nr), lambda i, k: (0, 0)),   # resident RHS
                      pl.BlockSpec((1, nr), lambda i, k: (0, 0)),    # b1 (folded BN)
                      pl.BlockSpec((nr, cp), lambda i, k: (0, 0)),   # w2
                      pl.BlockSpec((1, cp), lambda i, k: (0, 0))],   # b2
            out_specs=pl.BlockSpec((tm, cp), lambda i, k: (i, 0)),
            scratch_shapes=[pltpu.VMEM((tm, nr), jnp.float32)]),
        compiler_params=pltpu.CompilerParams(
            dimension_semantics=("parallel", "arbitrary"),
            vmem_limit_bytes=vmem_limit),
        cost_estimate=cost,
    )(a, b, b1, w2, b2)


def _mm_tiled_call(a, b, out_dtype, vmem_limit,
                   tm_cap=_TM_CAP, tn_cap=_TM_CAP, tk_cap=_TK_CAP):
    m, kd = a.shape
    _, nr = b.shape
    tm = _row_tile(m, tm_cap)
    tn = _pick_tile(nr, tn_cap)
    tk = _pick_tile(kd, tk_cap)
    cost = pl.CostEstimate(
        flops=2 * m * kd * nr, transcendentals=0,
        bytes_accessed=(m * kd * a.dtype.itemsize + kd * nr * b.dtype.itemsize
                        + m * nr * jnp.dtype(out_dtype).itemsize))
    return pl.pallas_call(
        _mm_tiled_kernel,
        out_shape=jax.ShapeDtypeStruct((m, nr), out_dtype),
        grid_spec=pltpu.PrefetchScalarGridSpec(
            num_scalar_prefetch=0,
            grid=(m // tm, nr // tn, kd // tk),
            in_specs=[pl.BlockSpec((tm, tk), lambda i, j, k: (i, k)),
                      pl.BlockSpec((tk, tn), lambda i, j, k: (k, j))],
            out_specs=pl.BlockSpec((tm, tn), lambda i, j, k: (i, j)),
            scratch_shapes=[pltpu.VMEM((tm, tn), jnp.float32)]),
        compiler_params=pltpu.CompilerParams(
            dimension_semantics=("parallel", "parallel", "arbitrary"),
            vmem_limit_bytes=vmem_limit),
        cost_estimate=cost,
    )(a, b)


def _mlp_tail_call(ft, b1, w2, b2, vmem_limit, tm_cap=_TM_CAP):
    m, hp = ft.shape
    cp = w2.shape[1]
    tm = _row_tile(m, tm_cap)
    cost = pl.CostEstimate(
        flops=2 * m * hp * cp + 2 * m * hp, transcendentals=0,
        bytes_accessed=(m * hp * ft.dtype.itemsize + hp * cp * w2.dtype.itemsize
                        + m * cp * 4))
    return pl.pallas_call(
        _mlp_tail_kernel,
        out_shape=jax.ShapeDtypeStruct((m, cp), jnp.float32),
        grid_spec=pltpu.PrefetchScalarGridSpec(
            num_scalar_prefetch=0,
            grid=(m // tm,),
            in_specs=[pl.BlockSpec((tm, hp), lambda i: (i, 0)),
                      pl.BlockSpec((1, hp), lambda i: (0, 0)),
                      pl.BlockSpec((hp, cp), lambda i: (0, 0)),
                      pl.BlockSpec((1, cp), lambda i: (0, 0))],
            out_specs=pl.BlockSpec((tm, cp), lambda i: (i, 0))),
        compiler_params=pltpu.CompilerParams(
            dimension_semantics=("parallel",),
            vmem_limit_bytes=vmem_limit),
        cost_estimate=cost,
    )(ft, b1, w2, b2)


# ------------------------------- dispatchers -----------------------------------

def _matmul(a, b, out_dtype, budget):
    """a @ b with the RHS VMEM-resident if it fits; tiled 3-D grid otherwise."""
    m, kd = a.shape
    _, nr = b.shape
    tm = _row_tile(m)
    tk = _pick_tile(kd, _TK_CAP)
    if _rhs_resident_fits(kd, nr, tm, tk, a.dtype.itemsize, budget):
        return _mm_resident_call(a, b, out_dtype, tm, tk, budget)
    return _mm_tiled_call(a, b, out_dtype, budget)


def _matmul_fused_tail(a, b, b1, w2, b2, budget):
    """relu(a @ b + b1) @ w2 + b2, fused into the matmul epilogue when possible."""
    m, kd = a.shape
    _, nr = b.shape
    cp = w2.shape[1]
    tm = _row_tile(m)
    tk = _pick_tile(kd, _TK_CAP)
    extra = 2 * nr * cp * w2.dtype.itemsize + 2 * (nr + cp) * 4
    if _rhs_resident_fits(kd, nr, tm, tk, a.dtype.itemsize, budget,
                          extra_bytes=extra):
        return _mm_resident_tail_call(a, b, b1, w2, b2, tm, tk, budget)
    ft = _mm_tiled_call(a, b, a.dtype, budget)
    return _mlp_tail_call(ft, b1, w2, b2, budget)


# ------------------------------- forward ---------------------------------------

def prepare_adjacency(adj, compute_dtype=jnp.bfloat16):
    """Pad + cast the (static) normalized adjacency once, outside the forward."""
    n = adj.shape[0]
    np_ = _pad_dim(n)
    return jnp.pad(adj, ((0, np_ - n), (0, np_ - n))).astype(compute_dtype)


@functools.partial(jax.jit, static_argnames=("k_hops", "compute_dtype"))
def sgc_forward(a_p, feat, w1, b1, gamma, beta, mean, var, w2, b2,
                k_hops=K_HOPS, compute_dtype=jnp.bfloat16):
    """SGC forward. a_p is the pre-padded bf16 adjacency (prepare_adjacency)."""
    n, f_in = feat.shape
    np_ = a_p.shape[0]
    assert np_ == _pad_dim(n), "adjacency must come from prepare_adjacency()"
    h_dim = w1.shape[1]
    c = w2.shape[1]

    # Fold BatchNorm1d (eval-mode running stats) and the fc1 bias into fc1.
    scale = gamma * jax.lax.rsqrt(var + BN_EPS)                 # (1, H)
    w1f = w1 * scale                                            # (F, H)
    b1f = (b1 - mean) * scale + beta                            # (1, H)

    fp = _pad_dim(f_in, _TK_CAP)
    hp = _round_up(h_dim, _LANE)
    cp = _round_up(c, _LANE)

    cd = compute_dtype
    x_p = jnp.pad(feat, ((0, np_ - n), (0, fp - f_in))).astype(cd)
    w1_p = jnp.pad(w1f, ((0, fp - f_in), (0, hp - h_dim))).astype(cd)
    b1_p = jnp.pad(b1f, ((0, 0), (0, hp - h_dim))).astype(jnp.float32)
    w2_p = jnp.pad(w2, ((0, hp - h_dim), (0, cp - c))).astype(cd)
    b2_p = jnp.pad(b2, ((0, 0), (0, cp - c))).astype(jnp.float32)

    budget = _vmem_budget()

    if h_dim <= f_in:
        # Transform first: A^K (X W1) == (A^K X) W1 -> hops act on (N, H).
        if k_hops == 0:
            out_p = _matmul_fused_tail(x_p, w1_p, b1_p, w2_p, b2_p, budget)
        else:
            ft = _matmul(x_p, w1_p, cd, budget)
            for _ in range(k_hops - 1):
                ft = _matmul(a_p, ft, cd, budget)
            out_p = _matmul_fused_tail(a_p, ft, b1_p, w2_p, b2_p, budget)
    else:
        ft = x_p
        for _ in range(k_hops):
            ft = _matmul(a_p, ft, cd, budget)
        out_p = _matmul_fused_tail(ft, w1_p, b1_p, w2_p, b2_p, budget)

    return out_p[:n, :c]


def build_gcn_norm_adj(key, n):
    """Random symmetric graph with self-loops, D^-1/2 A D^-1/2 normalization."""
    a = (jax.random.uniform(key, (n, n)) < 0.1).astype(jnp.float32)
    a = jnp.maximum(a, a.T)                                     # symmetric
    a = jnp.minimum(a + jnp.eye(n, dtype=jnp.float32), 1.0)     # self-loops
    deg = jnp.sum(a, axis=1)
    d_inv_sqrt = 1.0 / jnp.sqrt(deg)
    return a * d_inv_sqrt[:, None] * d_inv_sqrt[None, :]


if __name__ == "__main__":
    # Small shapes: 64 nodes, 32 input feats, 32 hidden, 8 classes.
    N, IN_FEATS, N_HIDDEN, NUM_CLASSES = 64, 32, 32, 8

    root = jax.random.PRNGKey(0)
    k_adj, k_feat, k_w1, k_b1, k_w2, k_b2 = jax.random.split(root, 6)

    adj = build_gcn_norm_adj(k_adj, N)
    feat = jax.random.normal(k_feat, (N, IN_FEATS), dtype=jnp.float32)

    # Deterministic parameter init mimicking nn.Linear.reset_parameters bounds.
    bnd1 = 1.0 / (IN_FEATS ** 0.5)
    w1 = jax.random.uniform(k_w1, (IN_FEATS, N_HIDDEN), jnp.float32,
                            -bnd1, bnd1)          # fc1.weight.T
    b1 = jax.random.uniform(k_b1, (1, N_HIDDEN), jnp.float32, -bnd1, bnd1)

    bnd2 = 1.0 / (N_HIDDEN ** 0.5)
    w2 = jax.random.uniform(k_w2, (N_HIDDEN, NUM_CLASSES), jnp.float32,
                            -bnd2, bnd2)          # fc2.weight.T
    b2 = jax.random.uniform(k_b2, (1, NUM_CLASSES), jnp.float32, -bnd2, bnd2)

    # BatchNorm1d parameters at construction (eval-mode stats).
    gamma = jnp.ones((1, N_HIDDEN), jnp.float32)
    beta = jnp.zeros((1, N_HIDDEN), jnp.float32)
    run_mean = jnp.zeros((1, N_HIDDEN), jnp.float32)
    run_var = jnp.ones((1, N_HIDDEN), jnp.float32)

    # Static graph -> pad + cast the adjacency once, outside the forward.
    a_p = jax.block_until_ready(prepare_adjacency(adj))

    out = sgc_forward(a_p, feat, w1, b1, gamma, beta, run_mean, run_var, w2, b2)
    out = jax.block_until_ready(out)

    # Pure-JAX f32 reference with the original op ordering / semantics.
    ft = feat
    for _ in range(K_HOPS):
        ft = adj @ ft
    h_ref = ft @ w1 + b1
    h_ref = (h_ref - run_mean) / jnp.sqrt(run_var + BN_EPS) * gamma + beta
    h_ref = jnp.maximum(h_ref, 0.0)
    ref = h_ref @ w2 + b2

    assert out.shape == (N, NUM_CLASSES)
    # bf16 operands with f32 MXU accumulation -> loose tolerance vs f32 reference.
    assert jnp.allclose(out, ref, atol=5e-2, rtol=5e-2), float(
        jnp.max(jnp.abs(out - ref)))

    print("KERNEL_OK")
</pallas_src>

<mosaic_0001>
module attributes {stable_mosaic.version = 11 : i64} {
  func.func @_mm_resident_kernel(%arg0: i32, %arg1: i32, %arg2: memref<128x128xbf16, #tpu.memory_space<vmem>>, %arg3: memref<128x128xbf16, #tpu.memory_space<vmem>>, %arg4: memref<128x128xbf16, #tpu.memory_space<vmem>>, %arg5: memref<128x128xf32, #tpu.memory_space<vmem>>) attributes {dimension_semantics = [#tpu.dimension_semantics<parallel>, #tpu.dimension_semantics<arbitrary>], iteration_bounds = array<i64: 1, 1>, scalar_prefetch = 0 : i64, scratch_operands = 1 : i64, tpu.core_type = #tpu.core_type<tc>, window_params = [{transform_indices = @transform_0, window_bounds = array<i64: 128, 128>}, {pipeline_mode = #tpu.pipeline_mode<synchronous>, transform_indices = @transform_1, window_bounds = array<i64: 128, 128>}, {transform_indices = @transform_2, window_bounds = array<i64: 128, 128>}]} {
    %c0_i32 = arith.constant 0 : i32
    %0 = arith.cmpi eq, %arg1, %c0_i32 : i32
    %1 = arith.extui %0 : i1 to i32
    %c0_i32_0 = arith.constant 0 : i32
    %2 = arith.cmpi ne, %1, %c0_i32_0 : i32
    scf.if %2 {
      %cst_9 = arith.constant 0.000000e+00 : f32
      %15 = vector.broadcast %cst_9 : f32 to vector<128x128xf32>
      %c0_10 = arith.constant 0 : index
      %c0_11 = arith.constant 0 : index
      %16 = vector.load %arg5[%c0_10, %c0_11] : memref<128x128xf32, #tpu.memory_space<vmem>>, vector<128x128xf32>
      tpu.vector_store %arg5[%c0_10, %c0_11], %15 {strides = array<i32>} : memref<128x128xf32, #tpu.memory_space<vmem>>, vector<128x128xf32>,
    } else {
    }
    %c128_i32 = arith.constant 128 : i32
    %3 = arith.muli %arg1, %c128_i32 : i32
    %4 = tpu.assume_multiple %3, 128 : i32
    %c0 = arith.constant 0 : index
    %c0_1 = arith.constant 0 : index
    %5 = vector.load %arg5[%c0, %c0_1] : memref<128x128xf32, #tpu.memory_space<vmem>>, vector<128x128xf32>
    %c0_2 = arith.constant 0 : index
    %c0_3 = arith.constant 0 : index
    %6 = vector.load %arg2[%c0_2, %c0_3] : memref<128x128xbf16, #tpu.memory_space<vmem>>, vector<128x128xbf16>
    %7 = arith.index_cast %4 : i32 to index
    %c0_4 = arith.constant 0 : index
    %8 = vector.load %arg3[%7, %c0_4] : memref<128x128xbf16, #tpu.memory_space<vmem>>, vector<128x128xbf16>
    %cst = arith.constant dense<0.000000e+00> : vector<128x128xf32>
    %9 = tpu.matmul %6, %8, %cst {dimension_numbers = #tpu.dot_dimension_numbers<[1], [0], [0], [1], [0, 0, 1, 1], [], []>} : vector<128x128xbf16>, vector<128x128xbf16>, vector<128x128xf32> -> vector<128x128xf32>
    %10 = arith.addf %5, %9 : vector<128x128xf32>
    %c0_5 = arith.constant 0 : index
    %c0_6 = arith.constant 0 : index
    %11 = vector.load %arg5[%c0_5, %c0_6] : memref<128x128xf32, #tpu.memory_space<vmem>>, vector<128x128xf32>
    tpu.vector_store %arg5[%c0_5, %c0_6], %10 {strides = array<i32>} : memref<128x128xf32, #tpu.memory_space<vmem>>, vector<128x128xf32>,
    %c0_i32_7 = arith.constant 0 : i32
    %12 = arith.cmpi eq, %arg1, %c0_i32_7 : i32
    %13 = arith.extui %12 : i1 to i32
    %c0_i32_8 = arith.constant 0 : i32
    %14 = arith.cmpi ne, %13, %c0_i32_8 : i32
    scf.if %14 {
      %c0_9 = arith.constant 0 : index
      %c0_10 = arith.constant 0 : index
      %15 = vector.load %arg5[%c0_9, %c0_10] : memref<128x128xf32, #tpu.memory_space<vmem>>, vector<128x128xf32>
      %16 = arith.truncf %15 : vector<128x128xf32> to vector<128x128xbf16>
      %c0_11 = arith.constant 0 : index
      %c0_12 = arith.constant 0 : index
      %17 = vector.load %arg4[%c0_11, %c0_12] : memref<128x128xbf16, #tpu.memory_space<vmem>>, vector<128x128xbf16>
      tpu.vector_store %arg4[%c0_11, %c0_12], %16 {strides = array<i32>} : memref<128x128xbf16, #tpu.memory_space<vmem>>, vector<128x128xbf16>,
    } else {
    }
    return
  }
  func.func @transform_0(%arg0: i32, %arg1: i32) -> (i32, i32) {
    %c0_i32 = arith.constant 0 : i32
    return %arg0, %arg1 : i32, i32
  }
  func.func @transform_1(%arg0: i32, %arg1: i32) -> (i32, i32) {
    %c0_i32 = arith.constant 0 : i32
    %c0_i32_0 = arith.constant 0 : i32
    %c0_i32_1 = arith.constant 0 : i32
    return %c0_i32, %c0_i32_0 : i32, i32
  }
  func.func @transform_2(%arg0: i32, %arg1: i32) -> (i32, i32) {
    %c0_i32 = arith.constant 0 : i32
    %c0_i32_0 = arith.constant 0 : i32
    return %arg0, %c0_i32 : i32, i32
  }
}

module attributes {stable_mosaic.version = 11 : i64} {
  func.func @_mm_resident_tail_kernel(%arg0: i32, %arg1: i32, %arg2: memref<128x128xbf16, #tpu.memory_space<vmem>>, %arg3: memref<128x128xbf16, #tpu.memory_space<vmem>>, %arg4: memref<1x128xf32, #tpu.memory_space<vmem>>, %arg5: memref<128x128xbf16, #tpu.memory_space<vmem>>, %arg6: memref<1x128xf32, #tpu.memory_space<vmem>>, %arg7: memref<128x128xf32, #tpu.memory_space<vmem>>, %arg8: memref<128x128xf32, #tpu.memory_space<vmem>>) attributes {dimension_semantics = [#tpu.dimension_semantics<parallel>, #tpu.dimension_semantics<arbitrary>], iteration_bounds = array<i64: 1, 1>, scalar_prefetch = 0 : i64, scratch_operands = 1 : i64, tpu.core_type = #tpu.core_type<tc>, window_params = [{transform_indices = @transform_0, window_bounds = array<i64: 128, 128>}, {pipeline_mode = #tpu.pipeline_mode<synchronous>, transform_indices = @transform_1, window_bounds = array<i64: 128, 128>}, {pipeline_mode = #tpu.pipeline_mode<synchronous>, transform_indices = @transform_2, window_bounds = array<i64: 1, 128>}, {pipeline_mode = #tpu.pipeline_mode<synchronous>, transform_indices = @transform_3, window_bounds = array<i64: 128, 128>}, {pipeline_mode = #tpu.pipeline_mode<synchronous>, transform_indices = @transform_4, window_bounds = array<i64: 1, 128>}, {transform_indices = @transform_5, window_bounds = array<i64: 128, 128>}]} {
    %c0_i32 = arith.constant 0 : i32
    %0 = arith.cmpi eq, %arg1, %c0_i32 : i32
    %1 = arith.extui %0 : i1 to i32
    %c0_i32_0 = arith.constant 0 : i32
    %2 = arith.cmpi ne, %1, %c0_i32_0 : i32
    scf.if %2 {
      %cst_9 = arith.constant 0.000000e+00 : f32
      %15 = vector.broadcast %cst_9 : f32 to vector<128x128xf32>
      %c0_10 = arith.constant 0 : index
      %c0_11 = arith.constant 0 : index
      %16 = vector.load %arg8[%c0_10, %c0_11] : memref<128x128xf32, #tpu.memory_space<vmem>>, vector<128x128xf32>
      tpu.vector_store %arg8[%c0_10, %c0_11], %15 {strides = array<i32>} : memref<128x128xf32, #tpu.memory_space<vmem>>, vector<128x128xf32>,
    } else {
    }
    %c128_i32 = arith.constant 128 : i32
    %3 = arith.muli %arg1, %c128_i32 : i32
    %4 = tpu.assume_multiple %3, 128 : i32
    %c0 = arith.constant 0 : index
    %c0_1 = arith.constant 0 : index
    %5 = vector.load %arg8[%c0, %c0_1] : memref<128x128xf32, #tpu.memory_space<vmem>>, vector<128x128xf32>
    %c0_2 = arith.constant 0 : index
    %c0_3 = arith.constant 0 : index
    %6 = vector.load %arg2[%c0_2, %c0_3] : memref<128x128xbf16, #tpu.memory_space<vmem>>, vector<128x128xbf16>
    %7 = arith.index_cast %4 : i32 to index
    %c0_4 = arith.constant 0 : index
    %8 = vector.load %arg3[%7, %c0_4] : memref<128x128xbf16, #tpu.memory_space<vmem>>, vector<128x128xbf16>
    %cst = arith.constant dense<0.000000e+00> : vector<128x128xf32>
    %9 = tpu.matmul %6, %8, %cst {dimension_numbers = #tpu.dot_dimension_numbers<[1], [0], [0], [1], [0, 0, 1, 1], [], []>} : vector<128x128xbf16>, vector<128x128xbf16>, vector<128x128xf32> -> vector<128x128xf32>
    %10 = arith.addf %5, %9 : vector<128x128xf32>
    %c0_5 = arith.constant 0 : index
    %c0_6 = arith.constant 0 : index
    %11 = vector.load %arg8[%c0_5, %c0_6] : memref<128x128xf32, #tpu.memory_space<vmem>>, vector<128x128xf32>
    tpu.vector_store %arg8[%c0_5, %c0_6], %10 {strides = array<i32>} : memref<128x128xf32, #tpu.memory_space<vmem>>, vector<128x128xf32>,
    %c0_i32_7 = arith.constant 0 : i32
    %12 = arith.cmpi eq, %arg1, %c0_i32_7 : i32
    %13 = arith.extui %12 : i1 to i32
    %c0_i32_8 = arith.constant 0 : i32
    %14 = arith.cmpi ne, %13, %c0_i32_8 : i32
    scf.if %14 {
      %c0_9 = arith.constant 0 : index
      %c0_10 = arith.constant 0 : index
      %15 = vector.load %arg8[%c0_9, %c0_10] : memref<128x128xf32, #tpu.memory_space<vmem>>, vector<128x128xf32>
      %c0_11 = arith.constant 0 : index
      %c0_12 = arith.constant 0 : index
      %16 = vector.load %arg4[%c0_11, %c0_12] : memref<1x128xf32, #tpu.memory_space<vmem>>, vector<1x128xf32>
      %17 = vector.broadcast %16 : vector<1x128xf32> to vector<128x128xf32>
      %18 = arith.addf %15, %17 : vector<128x128xf32>
      %cst_13 = arith.constant 0.000000e+00 : f32
      %19 = vector.broadcast %cst_13 : f32 to vector<128x128xf32>
      %20 = arith.maximumf %18, %19 : vector<128x128xf32>
      %21 = arith.truncf %20 : vector<128x128xf32> to vector<128x128xbf16>
      %c0_14 = arith.constant 0 : index
      %c0_15 = arith.constant 0 : index
      %22 = vector.load %arg5[%c0_14, %c0_15] : memref<128x128xbf16, #tpu.memory_space<vmem>>, vector<128x128xbf16>
      %cst_16 = arith.constant dense<0.000000e+00> : vector<128x128xf32>
      %23 = tpu.matmul %21, %22, %cst_16 {dimension_numbers = #tpu.dot_dimension_numbers<[1], [0], [0], [1], [0, 0, 1, 1], [], []>} : vector<128x128xbf16>, vector<128x128xbf16>, vector<128x128xf32> -> vector<128x128xf32>
      %c0_17 = arith.constant 0 : index
      %c0_18 = arith.constant 0 : index
      %24 = vector.load %arg6[%c0_17, %c0_18] : memref<1x128xf32, #tpu.memory_space<vmem>>, vector<1x128xf32>
      %25 = vector.broadcast %24 : vector<1x128xf32> to vector<128x128xf32>
      %26 = arith.addf %23, %25 : vector<128x128xf32>
      %c0_19 = arith.constant 0 : index
      %c0_20 = arith.constant 0 : index
      %27 = vector.load %arg7[%c0_19, %c0_20] : memref<128x128xf32, #tpu.memory_space<vmem>>, vector<128x128xf32>
      tpu.vector_store %arg7[%c0_19, %c0_20], %26 {strides = array<i32>} : memref<128x128xf32, #tpu.memory_space<vmem>>, vector<128x128xf32>,
    } else {
    }
    return
  }
  func.func @transform_0(%arg0: i32, %arg1: i32) -> (i32, i32) {
    %c0_i32 = arith.constant 0 : i32
    return %arg0, %arg1 : i32, i32
  }
  func.func @transform_1(%arg0: i32, %arg1: i32) -> (i32, i32) {
    %c0_i32 = arith.constant 0 : i32
    %c0_i32_0 = arith.constant 0 : i32
    %c0_i32_1 = arith.constant 0 : i32
    return %c0_i32, %c0_i32_0 : i32, i32
  }
  func.func @transform_2(%arg0: i32, %arg1: i32) -> (i32, i32) {
    %c0_i32 = arith.constant 0 : i32
    %c0_i32_0 = arith.constant 0 : i32
    %c0_i32_1 = arith.constant 0 : i32
    return %c0_i32, %c0_i32_0 : i32, i32
  }
  func.func @transform_3(%arg0: i32, %arg1: i32) -> (i32, i32) {
    %c0_i32 = arith.constant 0 : i32
    %c0_i32_0 = arith.constant 0 : i32
    %c0_i32_1 = arith.constant 0 : i32
    return %c0_i32, %c0_i32_0 : i32, i32
  }
  func.func @transform_4(%arg0: i32, %arg1: i32) -> (i32, i32) {
    %c0_i32 = arith.constant 0 : i32
    %c0_i32_0 = arith.constant 0 : i32
    %c0_i32_1 = arith.constant 0 : i32
    return %c0_i32, %c0_i32_0 : i32, i32
  }
  func.func @transform_5(%arg0: i32, %arg1: i32) -> (i32, i32) {
    %c0_i32 = arith.constant 0 : i32
    %c0_i32_0 = arith.constant 0 : i32
    return %arg0, %c0_i32 : i32, i32
  }
}

</mosaic_0001>

<bundles_post_ra>
// kernel: sgc_forward.4
= control target key start
LH: loop header
LB: loop body
LE: loop exit
PB: predicated region body
PF: predicated region fallthrough
CT: control target
= control target key end

     0   :  { %s677_s1 = inlined_call_operand.vmem [shape: bf16[128,128], index: 1, kind: input, shape index: {}]   ;;  %s678_s0 = inlined_call_operand.vmem [shape: bf16[128,128], index: 0, kind: input, shape index: {}]   ;;  %s679_s2 = inlined_call_operand.vmem [shape: bf16[128,128], index: 2, kind: output, shape index: {}]  }
   0x1   :  { %v574_v0 = vld [vmem:[%s677_s1] sm:$0xff]   ;;  %v575_v1 = vld [vmem:[%s677_s1 + $0x8] sm:$0xff]   ;;  %v576_v2 = vld [vmem:[%s677_s1 + $0x10] sm:$0xff]  }
   0x2   :  { %526 = vmatprep.subr.bf16.mxu0 %v574_v0  ;;  %558 = vmatprep.subr.bf16.mxu1 %v574_v0  ;;  %v577_v3 = vld [vmem:[%s677_s1 + $0x18] sm:$0xff]   ;;  %v582_v4 = vld [vmem:[%s678_s0] sm:$0xff]   ;;  %v579_v7 = vld [vmem:[%s677_s1 + $0x28] sm:$0xff]  }
   0x3   :  { %527 = vmatpush3.bf16.msra.mxu0 %v574_v0  ;;  %566 = vmatpush3.bf16.msra.mxu1 %v574_v0  ;;  %v583_v5 = vld [vmem:[%s678_s0 + $0x20] sm:$0xff]   ;;  %v580_v8 = vld [vmem:[%s677_s1 + $0x30] sm:$0xff]   ;;  %v581_v9 = vld [vmem:[%s677_s1 + $0x38] sm:$0xff]  }
   0x4   :  { %528 = vmatprep.subr.bf16.mxu0 %v575_v1  ;;  %559 = vmatprep.subr.bf16.mxu1 %v575_v1  ;;  %v578_v6 = vld [vmem:[%s677_s1 + $0x20] sm:$0xff]   ;;  %v584_v10 = vld [vmem:[%s678_s0 + $0x8] sm:$0xff]   ;;  %v586_v12 = vld [vmem:[%s678_s0 + $0x10] sm:$0xff]  }
   0x5   :  { %542 = vmatprep.mubr.bf16.mxu0 %v582_v4  ;;  %550 = vmatprep.mubr.bf16.mxu1 %v583_v5  ;;  %v585_v11 = vld [vmem:[%s678_s0 + $0x28] sm:$0xff]   ;;  %v587_v13 = vld [vmem:[%s678_s0 + $0x30] sm:$0xff]   ;;  %v588_v14 = vld [vmem:[%s678_s0 + $0x18] sm:$0xff]  }
   0x6   :  { %v589_v15 = vld [vmem:[%s678_s0 + $0x38] sm:$0xff]  }
   0x7   :  { %529 = vmatpush3.bf16.msra.mxu0 %v575_v1  ;;  %567 = vmatpush3.bf16.msra.mxu1 %v575_v1 }
   0x8   :  { %530 = vmatprep.subr.bf16.mxu0 %v576_v2  ;;  %560 = vmatprep.subr.bf16.mxu1 %v576_v2 }
   0xb   :  { %531 = vmatpush3.bf16.msra.mxu0 %v576_v2  ;;  %568 = vmatpush3.bf16.msra.mxu1 %v576_v2 }
   0xc   :  { %532 = vmatprep.subr.bf16.mxu0 %v577_v3  ;;  %561 = vmatprep.subr.bf16.mxu1 %v577_v3 }
   0xf   :  { %533 = vmatpush3.bf16.msra.mxu0 %v577_v3  ;;  %569 = vmatpush3.bf16.msra.mxu1 %v577_v3 }
  0x10   :  { %534 = vmatprep.subr.bf16.mxu0 %v578_v6  ;;  %562 = vmatprep.subr.bf16.mxu1 %v578_v6 }
  0x13   :  { %535 = vmatpush3.bf16.msra.mxu0 %v578_v6  ;;  %570 = vmatpush3.bf16.msra.mxu1 %v578_v6 }
  0x14   :  { %536 = vmatprep.subr.bf16.mxu0 %v579_v7  ;;  %563 = vmatprep.subr.bf16.mxu1 %v579_v7 }
  0x17   :  { %537 = vmatpush3.bf16.msra.mxu0 %v579_v7  ;;  %571 = vmatpush3.bf16.msra.mxu1 %v579_v7 }
  0x18   :  { %538 = vmatprep.subr.bf16.mxu0 %v580_v8  ;;  %564 = vmatprep.subr.bf16.mxu1 %v580_v8 }
  0x1b   :  { %539 = vmatpush3.bf16.msra.mxu0 %v580_v8  ;;  %572 = vmatpush3.bf16.msra.mxu1 %v580_v8 }
  0x1c   :  { %540 = vmatprep.subr.bf16.mxu0 %v581_v9  ;;  %565 = vmatprep.subr.bf16.mxu1 %v581_v9 }
  0x1f   :  { %541 = vmatpush3.bf16.msra.mxu0 %v581_v9  ;;  %573 = vmatpush3.bf16.msra.mxu1 %v581_v9 }
  0x22   :  { %543 = vmatmul.mubr.bf16.vlgmr.msra.gmra.mrb[0].mxu0 %v584_v10  ;;  %551 = vmatmul.mubr.bf16.vlgmr.msra.gmra.mrb[0].mxu1 %v585_v11 }
  0x23   :  { %546 = vmatprep.mubr.bf16.mxu0 %v586_v12  ;;  %554 = vmatprep.mubr.bf16.mxu1 %v587_v13 }
  0x2a   :  { %547 = vmatmul.mubr.bf16.gmra.mrb[4].mxu0 %v588_v14  ;;  %555 = vmatmul.mubr.bf16.gmra.mrb[4].mxu1 %v589_v15 }
  0xf5   :  { %v544_v16 = vpop.f32.mrb[0].mxu0  ;;  %v552_v17 = vpop.f32.mrb[0].mxu1 }
  0xf6   :  { %v215_v18 = vpop.f32.mrb[1].mxu0  ;;  %v247_v19 = vpop.f32.mrb[1].mxu1 }
  0xf7   :  { %v545_v20 = vpop.f32.mrb[2].mxu0  ;;  %v553_v21 = vpop.f32.mrb[2].mxu1 }
  0xf8   :  { %v471_v22 = vpack.c.bf16 %v545_v20, %v544_v16  ;;  %v491_v23 = vpack.c.bf16 %v553_v21, %v552_v17  ;;  %v218_v24 = vpop.f32.mrb[3].mxu0  ;;  %v250_v25 = vpop.f32.mrb[3].mxu1 }
  0xf9   :  { %v466_v26 = vpack.c.bf16 %v218_v24, %v215_v18  ;;  %v486_v27 = vpack.c.bf16 %v250_v25, %v247_v19 }
  0xfa   :  { %503 = vst [vmem:[%s679_s2 + $0x8] sm:$0xff] %v471_v22   ;;  %507 = vst [vmem:[%s679_s2 + $0x28] sm:$0xff] %v491_v23  }
  0xfb   :  { %467 = vst [vmem:[%s679_s2] sm:$0xff] %v466_v26   ;;  %506 = vst [vmem:[%s679_s2 + $0x20] sm:$0xff] %v486_v27  }
  0xfd   :  { %v548_v28 = vpop.f32.mrb[4].mxu0  ;;  %v556_v29 = vpop.f32.mrb[4].mxu1 }
  0xfe   :  { %v231_v30 = vpop.f32.mrb[5].mxu0  ;;  %v263_v31 = vpop.f32.mrb[5].mxu1 }
  0xff   :  { %v549_v32 = vpop.f32.mrb[6].mxu0  ;;  %v557_v33 = vpop.f32.mrb[6].mxu1 }
 0x100   :  { %v481_v34 = vpack.c.bf16 %v549_v32, %v548_v28  ;;  %v501_v35 = vpack.c.bf16 %v557_v33, %v556_v29  ;;  %v234_v36 = vpop.f32.mrb[7].mxu0  ;;  %v266_v37 = vpop.f32.mrb[7].mxu1 }
 0x101   :  { %v476_v38 = vpack.c.bf16 %v234_v36, %v231_v30  ;;  %v496_v39 = vpack.c.bf16 %v266_v37, %v263_v31 }
 0x102   :  { %505 = vst [vmem:[%s679_s2 + $0x18] sm:$0xff] %v481_v34   ;;  %509 = vst [vmem:[%s679_s2 + $0x38] sm:$0xff] %v501_v35  }
 0x103   :  { %504 = vst [vmem:[%s679_s2 + $0x10] sm:$0xff] %v476_v38   ;;  %508 = vst [vmem:[%s679_s2 + $0x30] sm:$0xff] %v496_v39  }

// kernel: sgc_forward.7
= control target key start
LH: loop header
LB: loop body
LE: loop exit
PB: predicated region body
PF: predicated region fallthrough
CT: control target
= control target key end

     0   :  { %s877_s1 = inlined_call_operand.vmem [shape: bf16[128,128], index: 1, kind: input, shape index: {}]   ;;  %s878_s0 = inlined_call_operand.vmem [shape: bf16[128,128], index: 0, kind: input, shape index: {}]   ;;  %s879_s3 = inlined_call_operand.vmem [shape: bf16[128,128], index: 3, kind: input, shape index: {}]   ;;  %s880_s2 = inlined_call_operand.vmem [shape: f32[1,128], index: 2, kind: input, shape index: {}]   ;;  %s881_s4 = inlined_call_operand.vmem [shape: f32[1,128], index: 4, kind: input, shape index: {}]   ;;  %s882_s5 = inlined_call_operand.vmem [shape: f32[128,128], index: 5, kind: output, shape index: {}]  }
   0x1   :  { %v697_v0 = vld [vmem:[%s877_s1] sm:$0xff]   ;;  %v698_v1 = vld [vmem:[%s877_s1 + $0x8] sm:$0xff]   ;;  %v699_v2 = vld [vmem:[%s877_s1 + $0x10] sm:$0xff]  }
   0x2   :  { %633 = vmatprep.subr.bf16.mxu0 %v697_v0  ;;  %v700_v3 = vld [vmem:[%s877_s1 + $0x18] sm:$0xff]   ;;  %v705_v4 = vld [vmem:[%s878_s0] sm:$0xff]   ;;  %v702_v6 = vld [vmem:[%s877_s1 + $0x28] sm:$0xff]  }
   0x3   :  { %634 = vmatpush3.bf16.msra.mxu0 %v697_v0  ;;  %649 = vmatprep.mubr.bf16.mxu0 %v705_v4  ;;  %v701_v5 = vld [vmem:[%s877_s1 + $0x20] sm:$0xff]   ;;  %v714_v8 = vld [vmem:[%s879_s3 + $0x8] sm:$0xff]   ;;  %v703_v9 = vld [vmem:[%s877_s1 + $0x30] sm:$0xff]  }
   0x4   :  { %635 = vmatprep.subr.bf16.mxu0 %v698_v1  ;;  %v713_v7 = vld [vmem:[%s879_s3] sm:$0xff]   ;;  %v715_v10 = vld [vmem:[%s879_s3 + $0x10] sm:$0xff]   ;;  %v704_v11 = vld [vmem:[%s877_s1 + $0x38] sm:$0xff]  }
   0x5   :  { %665 = vmatprep.subr.bf16.mxu1 %v713_v7  ;;  %v716_v12 = vld [vmem:[%s879_s3 + $0x18] sm:$0xff]   ;;  %v717_v13 = vld [vmem:[%s879_s3 + $0x20] sm:$0xff]   ;;  %v706_v14 = vld [vmem:[%s878_s0 + $0x8] sm:$0xff]  }
   0x6   :  { %666 = vmatpush3.bf16.msra.mxu1 %v713_v7  ;;  %v707_v15 = vld [vmem:[%s878_s0 + $0x10] sm:$0xff]   ;;  %v718_v16 = vld [vmem:[%s879_s3 + $0x28] sm:$0xff]   ;;  %v708_v17 = vld [vmem:[%s878_s0 + $0x18] sm:$0xff]  }
   0x7   :  { %636 = vmatpush3.bf16.msra.mxu0 %v698_v1  ;;  %667 = vmatprep.subr.bf16.mxu1 %v714_v8  ;;  %v709_v18 = vld [vmem:[%s878_s0 + $0x20] sm:$0xff]   ;;  %v710_v19 = vld [vmem:[%s878_s0 + $0x28] sm:$0xff]   ;;  %v711_v20 = vld [vmem:[%s878_s0 + $0x30] sm:$0xff]  }
   0x8   :  { %637 = vmatprep.subr.bf16.mxu0 %v699_v2  ;;  %v712_v21 = vld [vmem:[%s878_s0 + $0x38] sm:$0xff]   ;;  %v719_v22 = vld [vmem:[%s879_s3 + $0x30] sm:$0xff]   ;;  %v591_v24 = vld [vmem:[%s880_s2] ss:$0 sm:$0xff] }
   0x9   :  { %v720_v23 = vld [vmem:[%s879_s3 + $0x38] sm:$0xff]  }
   0xa   :  { %668 = vmatpush3.bf16.msra.mxu1 %v714_v8 }
   0xb   :  { %638 = vmatpush3.bf16.msra.mxu0 %v699_v2  ;;  %669 = vmatprep.subr.bf16.mxu1 %v715_v10 }
   0xc   :  { %639 = vmatprep.subr.bf16.mxu0 %v700_v3 }
   0xe   :  { %670 = vmatpush3.bf16.msra.mxu1 %v715_v10 }
   0xf   :  { %640 = vmatpush3.bf16.msra.mxu0 %v700_v3  ;;  %671 = vmatprep.subr.bf16.mxu1 %v716_v12 }
  0x10   :  { %641 = vmatprep.subr.bf16.mxu0 %v701_v5 }
  0x12   :  { %672 = vmatpush3.bf16.msra.mxu1 %v716_v12 }
  0x13   :  { %642 = vmatpush3.bf16.msra.mxu0 %v701_v5  ;;  %673 = vmatprep.subr.bf16.mxu1 %v717_v13 }
  0x14   :  { %643 = vmatprep.subr.bf16.mxu0 %v702_v6 }
  0x16   :  { %674 = vmatpush3.bf16.msra.mxu1 %v717_v13 }
  0x17   :  { %644 = vmatpush3.bf16.msra.mxu0 %v702_v6  ;;  %675 = vmatprep.subr.bf16.mxu1 %v718_v16 }
  0x18   :  { %645 = vmatprep.subr.bf16.mxu0 %v703_v9 }
  0x1a   :  { %676 = vmatpush3.bf16.msra.mxu1 %v718_v16 }
  0x1b   :  { %646 = vmatpush3.bf16.msra.mxu0 %v703_v9  ;;  %677 = vmatprep.subr.bf16.mxu1 %v719_v22 }
  0x1c   :  { %647 = vmatprep.subr.bf16.mxu0 %v704_v11 }
  0x1e   :  { %678 = vmatpush3.bf16.msra.mxu1 %v719_v22 }
  0x1f   :  { %648 = vmatpush3.bf16.msra.mxu0 %v704_v11  ;;  %679 = vmatprep.subr.bf16.mxu1 %v720_v23 }
  0x22   :  { %650 = vmatmul.mubr.bf16.vlgmr.msra.gmra.mrb[0].mxu0 %v706_v14  ;;  %680 = vmatpush3.bf16.msra.mxu1 %v720_v23 }
  0x23   :  { %653 = vmatprep.mubr.bf16.mxu0 %v707_v15 }
  0x2a   :  { %654 = vmatmul.mubr.bf16.gmra.mrb[4].mxu0 %v708_v17  ;;  %v592_v17 = vld [vmem:[%s881_s4] ss:$0 sm:$0xff] }
  0x2b   :  { %657 = vmatprep.mubr.bf16.mxu0 %v709_v18 }
  0x32   :  { %658 = vmatmul.mubr.bf16.gmra.mrb[8].mxu0 %v710_v19 }
  0x33   :  { %661 = vmatprep.mubr.bf16.mxu0 %v711_v20 }
  0x3a   :  { %662 = vmatmul.mubr.bf16.gmra.mrb[12].mxu0 %v712_v21 }
  0xf5   :  { %v651_v25 = vpop.f32.mrb[0].mxu0 }
  0xf6   :  { %v347_v26 = vadd.f32 %v651_v25, %v591_v24  ;;  %v224_v27 = vpop.f32.mrb[1].mxu0 }
  0xf7   :  { %v345_v28 = vadd.f32 %v591_v24, %v224_v27  ;;  %v652_v29 = vpop.f32.mrb[2].mxu0 }
  0xf8   :  { %v348_v30 = vadd.f32 %v652_v29, %v591_v24  ;;  %v227_v31 = vpop.f32.mrb[3].mxu0  ;;  %v363_v33 = vmax.f32 %v347_v26, 0.0 }
  0xf9   :  { %v346_v32 = vadd.f32 %v591_v24, %v227_v31  ;;  %v361_v35 = vmax.f32 %v345_v28, 0.0 }
  0xfa   :  { %v364_v34 = vmax.f32 %v348_v30, 0.0 }
  0xfb   :  { %v362_v36 = vmax.f32 %v346_v32, 0.0 }
  0xfc   :  { %v378_v37 = vpack.c.bf16 %v364_v34, %v363_v33 }
  0xfd   :  { %v655_v38 = vpop.f32.mrb[4].mxu0  ;;  %v377_v39 = vpack.c.bf16 %v362_v36, %v361_v35 }
  0xfe   :  { %v351_v40 = vadd.f32 %v655_v38, %v591_v24  ;;  %v240_v41 = vpop.f32.mrb[5].mxu0 }
  0xff   :  { %v349_v42 = vadd.f32 %v591_v24, %v240_v41  ;;  %v656_v43 = vpop.f32.mrb[6].mxu0  ;;  %681 = vmatprep.mubr.bf16.mxu1 %v377_v39 }
 0x100   :  { %v352_v44 = vadd.f32 %v656_v43, %v591_v24  ;;  %v243_v45 = vpop.f32.mrb[7].mxu0  ;;  %682 = vmatmul.mubr.bf16.vlgmr.msra.gmra.mrb[0].mxu1 %v378_v37  ;;  %v367_v47 = vmax.f32 %v351_v40, 0.0 }
 0x101   :  { %v350_v46 = vadd.f32 %v591_v24, %v243_v45  ;;  %v365_v49 = vmax.f32 %v349_v42, 0.0 }
 0x102   :  { %v368_v48 = vmax.f32 %v352_v44, 0.0 }
 0x103   :  { %v366_v50 = vmax.f32 %v350_v46, 0.0 }
 0x104   :  { %v380_v51 = vpack.c.bf16 %v368_v48, %v367_v47 }
 0x105   :  { %v379_v52 = vpack.c.bf16 %v366_v50, %v365_v49  ;;  %v659_v53 = vpop.f32.mrb[8].mxu0 }
 0x106   :  { %v355_v54 = vadd.f32 %v659_v53, %v591_v24  ;;  %v256_v55 = vpop.f32.mrb[9].mxu0 }
 0x107   :  { %v353_v56 = vadd.f32 %v591_v24, %v256_v55  ;;  %v660_v57 = vpop.f32.mrb[10].mxu0  ;;  %685 = vmatprep.mubr.bf16.mxu1 %v379_v52 }
 0x108   :  { %v356_v58 = vadd.f32 %v660_v57, %v591_v24  ;;  %v259_v59 = vpop.f32.mrb[11].mxu0  ;;  %686 = vmatmul.mubr.bf16.gmra.mrb[4].mxu1 %v380_v51  ;;  %v371_v61 = vmax.f32 %v355_v54, 0.0 }
 0x109   :  { %v354_v60 = vadd.f32 %v591_v24, %v259_v59  ;;  %v369_v63 = vmax.f32 %v353_v56, 0.0 }
 0x10a   :  { %v372_v62 = vmax.f32 %v356_v58, 0.0 }
 0x10b   :  { %v370_v0 = vmax.f32 %v354_v60, 0.0 }
 0x10c   :  { %v382_v1 = vpack.c.bf16 %v372_v62, %v371_v61 }
 0x10d   :  { %v381_v2 = vpack.c.bf16 %v370_v0, %v369_v63  ;;  %v663_v3 = vpop.f32.mrb[12].mxu0 }
 0x10e   :  { %v359_v4 = vadd.f32 %v663_v3, %v591_v24  ;;  %v272_v5 = vpop.f32.mrb[13].mxu0 }
 0x10f   :  { %v357_v6 = vadd.f32 %v591_v24, %v272_v5  ;;  %v664_v7 = vpop.f32.mrb[14].mxu0  ;;  %689 = vmatprep.mubr.bf16.mxu1 %v381_v2 }
 0x110   :  { %v360_v8 = vadd.f32 %v664_v7, %v591_v24  ;;  %v275_v9 = vpop.f32.mrb[15].mxu0  ;;  %690 = vmatmul.mubr.bf16.gmra.mrb[8].mxu1 %v382_v1  ;;  %v375_v11 = vmax.f32 %v359_v4, 0.0 }
 0x111   :  { %v358_v10 = vadd.f32 %v591_v24, %v275_v9  ;;  %v373_v13 = vmax.f32 %v357_v6, 0.0 }
 0x112   :  { %v376_v12 = vmax.f32 %v360_v8, 0.0 }
 0x113   :  { %v374_v14 = vmax.f32 %v358_v10, 0.0 }
 0x114   :  { %v384_v15 = vpack.c.bf16 %v376_v12, %v375_v11 }
 0x115   :  { %v383_v16 = vpack.c.bf16 %v374_v14, %v373_v13 }
 0x117   :  { %693 = vmatprep.mubr.bf16.mxu1 %v383_v16 }
 0x118   :  { %694 = vmatmul.mubr.bf16.gmra.mrb[12].mxu1 %v384_v15 }
 0x1d3   :  { %v683_v18 = vpop.f32.mrb[0].mxu1 }
 0x1d4   :  { %v499_v19 = vadd.f32 %v683_v18, %v592_v17  ;;  %v490_v20 = vpop.f32.mrb[1].mxu1 }
 0x1d5   :  { %v491_v21 = vadd.f32 %v592_v17, %v490_v20  ;;  %v684_v22 = vpop.f32.mrb[2].mxu1 }
 0x1d6   :  { %555 = vst [vmem:[%s882_s5 + $0x10] sm:$0xff] %v499_v19  ;;  %v502_v23 = vadd.f32 %v684_v22, %v592_v17  ;;  %v493_v24 = vpop.f32.mrb[3].mxu1 }
 0x1d7   :  { %553 = vst [vmem:[%s882_s5] sm:$0xff] %v491_v21  ;;  %v494_v25 = vadd.f32 %v592_v17, %v493_v24 }
 0x1d8   :  { %556 = vst [vmem:[%s882_s5 + $0x18] sm:$0xff] %v502_v23 }
 0x1d9   :  { %554 = vst [vmem:[%s882_s5 + $0x8] sm:$0xff] %v494_v25 }
 0x1db   :  { %v687_v26 = vpop.f32.mrb[4].mxu1 }
 0x1dc   :  { %v515_v27 = vadd.f32 %v687_v26, %v592_v17  ;;  %v506_v28 = vpop.f32.mrb[5].mxu1 }
 0x1dd   :  { %v507_v29 = vadd.f32 %v592_v17, %v506_v28  ;;  %v688_v30 = vpop.f32.mrb[6].mxu1 }
 0x1de   :  { %559 = vst [vmem:[%s882_s5 + $0x30] sm:$0xff] %v515_v27  ;;  %v518_v31 = vadd.f32 %v688_v30, %v592_v17  ;;  %v509_v32 = vpop.f32.mrb[7].mxu1 }
 0x1df   :  { %557 = vst [vmem:[%s882_s5 + $0x20] sm:$0xff] %v507_v29  ;;  %v510_v33 = vadd.f32 %v592_v17, %v509_v32 }
 0x1e0   :  { %560 = vst [vmem:[%s882_s5 + $0x38] sm:$0xff] %v518_v31 }
 0x1e1   :  { %558 = vst [vmem:[%s882_s5 + $0x28] sm:$0xff] %v510_v33 }
 0x1e3   :  { %v691_v34 = vpop.f32.mrb[8].mxu1 }
 0x1e4   :  { %v531_v35 = vadd.f32 %v691_v34, %v592_v17  ;;  %v522_v36 = vpop.f32.mrb[9].mxu1 }
 0x1e5   :  { %v523_v37 = vadd.f32 %v592_v17, %v522_v36  ;;  %v692_v38 = vpop.f32.mrb[10].mxu1 }
 0x1e6   :  { %563 = vst [vmem:[%s882_s5 + $0x50] sm:$0xff] %v531_v35  ;;  %v534_v39 = vadd.f32 %v692_v38, %v592_v17  ;;  %v525_v40 = vpop.f32.mrb[11].mxu1 }
 0x1e7   :  { %561 = vst [vmem:[%s882_s5 + $0x40] sm:$0xff] %v523_v37  ;;  %v526_v41 = vadd.f32 %v592_v17, %v525_v40 }
 0x1e8   :  { %564 = vst [vmem:[%s882_s5 + $0x58] sm:$0xff] %v534_v39 }
 0x1e9   :  { %562 = vst [vmem:[%s882_s5 + $0x48] sm:$0xff] %v526_v41 }
 0x1eb   :  { %v695_v42 = vpop.f32.mrb[12].mxu1 }
 0x1ec   :  { %v547_v43 = vadd.f32 %v695_v42, %v592_v17  ;;  %v538_v44 = vpop.f32.mrb[13].mxu1 }
 0x1ed   :  { %v539_v45 = vadd.f32 %v592_v17, %v538_v44  ;;  %v696_v46 = vpop.f32.mrb[14].mxu1 }
 0x1ee   :  { %567 = vst [vmem:[%s882_s5 + $0x70] sm:$0xff] %v547_v43  ;;  %v550_v47 = vadd.f32 %v696_v46, %v592_v17  ;;  %v541_v48 = vpop.f32.mrb[15].mxu1 }
 0x1ef   :  { %565 = vst [vmem:[%s882_s5 + $0x60] sm:$0xff] %v539_v45  ;;  %v542_v49 = vadd.f32 %v592_v17, %v541_v48 }
 0x1f0   :  { %568 = vst [vmem:[%s882_s5 + $0x78] sm:$0xff] %v550_v47 }
 0x1f1   :  { %566 = vst [vmem:[%s882_s5 + $0x68] sm:$0xff] %v542_v49 }

</bundles_post_ra>
